<compile_context>
chip_gen: v6e
topology: v6e:2x2x1
jax: 0.10.0
libtpu: 0.0.40
codegen_flags: <defaults>
</compile_context>

<pallas_src>
import jax
import jax.numpy as jnp
from jax.experimental import pallas as pl
from jax.experimental.pallas import tpu as pltpu


HIDDEN = 128             # fixed by the module (Linear(input_dim, 128))
MAX_TILE_B = 2048        # batch tile cap for large batches
_TILE_CANDIDATES = (2048, 1536, 1024, 768, 512, 384, 256, 128)  # all sublane multiples


def dqn_mlp_kernel(x_ref, w1_ref, b1_ref, w2_ref, b2_ref, o_ref):
    # Cast the f32 x tile to bf16 in-kernel (VPU) — no separate wrapper pad/cast pass.
    x = x_ref[...].astype(jnp.bfloat16)
    # Layer 1: bf16 x bf16 -> f32 on the MXU; bias + ReLU in f32 on the VPU.
    h = jnp.dot(x, w1_ref[...], preferred_element_type=jnp.float32)
    h = jnp.maximum(h + b1_ref[...], 0.0)
    # Layer 2: downcast activations to bf16 only for the second MXU pass.
    out = jnp.dot(h.astype(jnp.bfloat16), w2_ref[...],
                  preferred_element_type=jnp.float32)
    o_ref[...] = (out + b2_ref[...]).astype(o_ref.dtype)


def prepare_params(w1, b1, w2, b2):
    """One-time bf16 cast of the weights (no padding — blocks use full dims)."""
    w1b = w1.astype(jnp.bfloat16)                      # (in_dim, 128)
    w2b = w2.astype(jnp.bfloat16)                      # (128, out_dim)
    b1f = b1.astype(jnp.float32).reshape(1, HIDDEN)    # (1, 128)
    b2f = b2.astype(jnp.float32).reshape(1, -1)        # (1, out_dim)
    return w1b, b1f, w2b, b2f


def _choose_tile_b(batch):
    """Single grid step (zero padding) for small batches; otherwise pick a large
    tile that keeps the final-tile padding waste minimal."""
    if batch <= MAX_TILE_B:
        return batch
    best = None
    for t in _TILE_CANDIDATES:
        pad = (-batch) % t
        key = (pad, -t)                 # least waste first, then largest tile
        if best is None or key < best[0]:
            best = (key, t)
    return best[1]


def dqn_forward(x, w1b, b1f, w2b, b2f):
    """Forward pass: x (batch, in_dim) f32 -> (batch, out_dim) f32."""
    batch, in_dim = x.shape
    out_dim = w2b.shape[1]

    tile_b = _choose_tile_b(batch)
    n_tiles = pl.cdiv(batch, tile_b)
    b_pad = n_tiles * tile_b

    xk = x
    if b_pad != batch:  # only large, non-tile-multiple batches; waste kept small by sweep
        xk = jnp.zeros((b_pad, in_dim), x.dtype).at[:batch, :].set(x)

    # Multi-buffer the streamed operands only when the grid actually pipelines.
    if n_tiles > 1:
        x_spec = pl.BlockSpec((tile_b, in_dim), lambda i: (i, 0),
                              pipeline_mode=pl.Buffered(3))
        o_spec = pl.BlockSpec((tile_b, out_dim), lambda i: (i, 0),
                              pipeline_mode=pl.Buffered(3))
    else:
        x_spec = pl.BlockSpec((tile_b, in_dim), lambda i: (i, 0))
        o_spec = pl.BlockSpec((tile_b, out_dim), lambda i: (i, 0))

    flops = 2 * b_pad * (in_dim * HIDDEN + HIDDEN * out_dim)
    bytes_accessed = (b_pad * in_dim * xk.dtype.itemsize
                      + b_pad * out_dim * x.dtype.itemsize
                      + w1b.size * 2 + w2b.size * 2
                      + b1f.size * 4 + b2f.size * 4)

    out = pl.pallas_call(
        dqn_mlp_kernel,
        out_shape=jax.ShapeDtypeStruct((b_pad, out_dim), x.dtype),
        grid_spec=pltpu.PrefetchScalarGridSpec(
            num_scalar_prefetch=0,
            grid=(n_tiles,),
            in_specs=[
                x_spec,                                              # x streams (f32, natural)
                pl.BlockSpec((in_dim, HIDDEN), lambda i: (0, 0)),    # W1 VMEM-resident
                pl.BlockSpec((1, HIDDEN), lambda i: (0, 0)),         # b1 resident
                pl.BlockSpec((HIDDEN, out_dim), lambda i: (0, 0)),   # W2 resident
                pl.BlockSpec((1, out_dim), lambda i: (0, 0)),        # b2 resident
            ],
            out_specs=o_spec,
        ),
        compiler_params=pltpu.CompilerParams(
            dimension_semantics=("parallel",),   # shard batch tiles across TCs on v7x
        ),
        cost_estimate=pl.CostEstimate(
            flops=flops, transcendentals=0, bytes_accessed=bytes_accessed),
    )(xk, w1b, b1f, w2b, b2f)

    if b_pad != batch:
        out = out[:batch]
    return out


def init_params(key, input_dim, hidden_dim, output_dim, dtype=jnp.float32):
    """Deterministic synthetic init (uniform, roughly matching nn.Linear scale)."""
    k1, k2, k3, k4 = jax.random.split(key, 4)
    lim1 = 1.0 / (input_dim ** 0.5)
    lim2 = 1.0 / (hidden_dim ** 0.5)
    w1 = jax.random.uniform(k1, (input_dim, hidden_dim), dtype, -lim1, lim1)
    b1 = jax.random.uniform(k2, (1, hidden_dim), dtype, -lim1, lim1)
    w2 = jax.random.uniform(k3, (hidden_dim, output_dim), dtype, -lim2, lim2)
    b2 = jax.random.uniform(k4, (1, output_dim), dtype, -lim2, lim2)
    return w1, b1, w2, b2


if __name__ == "__main__":
    key = jax.random.PRNGKey(0)
    kx, kp = jax.random.split(key)

    batch = 2
    input_dim = 16     # small state vector
    output_dim = 8     # number of actions

    x = jax.random.normal(kx, (batch, input_dim), jnp.float32)
    w1, b1, w2, b2 = init_params(kp, input_dim, HIDDEN, output_dim)

    # One-time weight prep (bf16 cast only), then the forward pass (single launch here).
    w1b, b1f, w2b, b2f = prepare_params(w1, b1, w2, b2)
    out = dqn_forward(x, w1b, b1f, w2b, b2f)
    out = jax.block_until_ready(out)

    assert out.shape == (batch, output_dim)
    assert out.dtype == jnp.float32

    # Reference using the same bf16-operand / f32-accumulate recipe (tight check).
    h_ref = jnp.maximum(
        jnp.dot(x.astype(jnp.bfloat16), w1.astype(jnp.bfloat16),
                preferred_element_type=jnp.float32) + b1, 0.0)
    ref_bf16 = jnp.dot(h_ref.astype(jnp.bfloat16), w2.astype(jnp.bfloat16),
                       preferred_element_type=jnp.float32) + b2
    assert jnp.allclose(out, ref_bf16, atol=1e-3, rtol=1e-3)

    # Full-precision reference of the module semantics (loose check for bf16 rounding).
    ref_f32 = jnp.maximum(x @ w1 + b1, 0.0) @ w2 + b2
    assert jnp.allclose(out, ref_f32, atol=3e-2, rtol=3e-2)

    print("KERNEL_OK")
</pallas_src>

<mosaic_0001>
module attributes {stable_mosaic.version = 11 : i64} {
  func.func @dqn_mlp_kernel(%arg0: i32, %arg1: memref<2x16xf32, #tpu.memory_space<vmem>>, %arg2: memref<16x128xbf16, #tpu.memory_space<vmem>>, %arg3: memref<1x128xf32, #tpu.memory_space<vmem>>, %arg4: memref<128x8xbf16, #tpu.memory_space<vmem>>, %arg5: memref<1x8xf32, #tpu.memory_space<vmem>>, %arg6: memref<2x8xf32, #tpu.memory_space<vmem>>) attributes {dimension_semantics = [#tpu.dimension_semantics<parallel>], iteration_bounds = array<i64: 1>, scalar_prefetch = 0 : i64, scratch_operands = 0 : i64, tpu.core_type = #tpu.core_type<tc>, window_params = [{transform_indices = @transform_0, window_bounds = array<i64: 2, 16>}, {pipeline_mode = #tpu.pipeline_mode<synchronous>, transform_indices = @transform_1, window_bounds = array<i64: 16, 128>}, {pipeline_mode = #tpu.pipeline_mode<synchronous>, transform_indices = @transform_2, window_bounds = array<i64: 1, 128>}, {pipeline_mode = #tpu.pipeline_mode<synchronous>, transform_indices = @transform_3, window_bounds = array<i64: 128, 8>}, {pipeline_mode = #tpu.pipeline_mode<synchronous>, transform_indices = @transform_4, window_bounds = array<i64: 1, 8>}, {transform_indices = @transform_5, window_bounds = array<i64: 2, 8>}]} {
    %c0 = arith.constant 0 : index
    %c0_0 = arith.constant 0 : index
    %0 = vector.load %arg1[%c0, %c0_0] : memref<2x16xf32, #tpu.memory_space<vmem>>, vector<2x16xf32>
    %1 = arith.truncf %0 : vector<2x16xf32> to vector<2x16xbf16>
    %c0_1 = arith.constant 0 : index
    %c0_2 = arith.constant 0 : index
    %2 = vector.load %arg2[%c0_1, %c0_2] : memref<16x128xbf16, #tpu.memory_space<vmem>>, vector<16x128xbf16>
    %cst = arith.constant dense<0.000000e+00> : vector<2x128xf32>
    %3 = tpu.matmul %1, %2, %cst {dimension_numbers = #tpu.dot_dimension_numbers<[1], [0], [0], [1], [0, 0, 1, 1], [], []>} : vector<2x16xbf16>, vector<16x128xbf16>, vector<2x128xf32> -> vector<2x128xf32>
    %c0_3 = arith.constant 0 : index
    %c0_4 = arith.constant 0 : index
    %4 = vector.load %arg3[%c0_3, %c0_4] : memref<1x128xf32, #tpu.memory_space<vmem>>, vector<1x128xf32>
    %5 = vector.broadcast %4 : vector<1x128xf32> to vector<2x128xf32>
    %6 = arith.addf %3, %5 : vector<2x128xf32>
    %cst_5 = arith.constant 0.000000e+00 : f32
    %7 = vector.broadcast %cst_5 : f32 to vector<2x128xf32>
    %8 = arith.maximumf %6, %7 : vector<2x128xf32>
    %9 = arith.truncf %8 : vector<2x128xf32> to vector<2x128xbf16>
    %c0_6 = arith.constant 0 : index
    %c0_7 = arith.constant 0 : index
    %10 = vector.load %arg4[%c0_6, %c0_7] : memref<128x8xbf16, #tpu.memory_space<vmem>>, vector<128x8xbf16>
    %cst_8 = arith.constant dense<0.000000e+00> : vector<2x8xf32>
    %11 = tpu.matmul %9, %10, %cst_8 {dimension_numbers = #tpu.dot_dimension_numbers<[1], [0], [0], [1], [0, 0, 1, 1], [], []>} : vector<2x128xbf16>, vector<128x8xbf16>, vector<2x8xf32> -> vector<2x8xf32>
    %c0_9 = arith.constant 0 : index
    %c0_10 = arith.constant 0 : index
    %12 = vector.load %arg5[%c0_9, %c0_10] : memref<1x8xf32, #tpu.memory_space<vmem>>, vector<1x8xf32>
    %13 = vector.broadcast %12 : vector<1x8xf32> to vector<2x8xf32>
    %14 = arith.addf %11, %13 : vector<2x8xf32>
    %c0_11 = arith.constant 0 : index
    %c0_12 = arith.constant 0 : index
    %15 = vector.load %arg6[%c0_11, %c0_12] : memref<2x8xf32, #tpu.memory_space<vmem>>, vector<2x8xf32>
    tpu.vector_store %arg6[%c0_11, %c0_12], %14 {strides = array<i32>} : memref<2x8xf32, #tpu.memory_space<vmem>>, vector<2x8xf32>,
    return
  }
  func.func @transform_0(%arg0: i32) -> (i32, i32) {
    %c0_i32 = arith.constant 0 : i32
    %c0_i32_0 = arith.constant 0 : i32
    return %arg0, %c0_i32 : i32, i32
  }
  func.func @transform_1(%arg0: i32) -> (i32, i32) {
    %c0_i32 = arith.constant 0 : i32
    %c0_i32_0 = arith.constant 0 : i32
    %c0_i32_1 = arith.constant 0 : i32
    return %c0_i32, %c0_i32_0 : i32, i32
  }
  func.func @transform_2(%arg0: i32) -> (i32, i32) {
    %c0_i32 = arith.constant 0 : i32
    %c0_i32_0 = arith.constant 0 : i32
    %c0_i32_1 = arith.constant 0 : i32
    return %c0_i32, %c0_i32_0 : i32, i32
  }
  func.func @transform_3(%arg0: i32) -> (i32, i32) {
    %c0_i32 = arith.constant 0 : i32
    %c0_i32_0 = arith.constant 0 : i32
    %c0_i32_1 = arith.constant 0 : i32
    return %c0_i32, %c0_i32_0 : i32, i32
  }
  func.func @transform_4(%arg0: i32) -> (i32, i32) {
    %c0_i32 = arith.constant 0 : i32
    %c0_i32_0 = arith.constant 0 : i32
    %c0_i32_1 = arith.constant 0 : i32
    return %c0_i32, %c0_i32_0 : i32, i32
  }
  func.func @transform_5(%arg0: i32) -> (i32, i32) {
    %c0_i32 = arith.constant 0 : i32
    %c0_i32_0 = arith.constant 0 : i32
    return %arg0, %c0_i32 : i32, i32
  }
}

</mosaic_0001>

<bundles_post_ra>
// kernel: tpu_custom_call.1
= control target key start
LH: loop header
LB: loop body
LE: loop exit
PB: predicated region body
PF: predicated region fallthrough
CT: control target
= control target key end

     0   :  { %v295_v1 = vmov 0.0   ;;  %vm296_vm0 = vmmov 0   ;;  %vm39_vm1 = vcmask 130048   ;;  %s367_s0 = inlined_call_operand.vmem [shape: f32[2,16], index: 0, kind: input, shape index: {}]   ;;  %s368_s1 = inlined_call_operand.vmem [shape: bf16[16,128], index: 1, kind: input, shape index: {}]   ;;  %s369_s2 = inlined_call_operand.vmem [shape: f32[1,128], index: 2, kind: input, shape index: {}]   ;;  %s370_s3 = inlined_call_operand.vmem [shape: bf16[128,8], index: 3, kind: input, shape index: {}]   ;;  %s371_s4 = inlined_call_operand.vmem [shape: f32[1,8], index: 4, kind: input, shape index: {}]   ;;  %s372_s5 = inlined_call_operand.hbm [shape: f32[2,8], index: 5, kind: output, shape index: {}]  }
   0x1   :  { %v264_v0 = vld [vmem:[%s368_s1] sm:$0xff]   ;;  %235 = vmatprep.subr.bf16.mxu0 %v295_v1  ;;  %241 = vmatprep.subr.bf16.mxu1 %v295_v1  ;;  %v265_v4 = vld [vmem:[%s370_s3 + $0x38] sm:$0xff]   ;;  %v266_v5 = vld [vmem:[%s370_s3 + $0x30] sm:$0xff]  }
   0x2   :  { %v22_v2 = vld [vmem:[%s367_s0] sm:$0x3]  ;;  %236 = vmatpush3.bf16.msra.mxu0 %v264_v0  ;;  %237 = vmatprep.mubr.msk.bf16.mxu0 %vm296_vm0, %v295_v1  ;;  %v267_v6 = vld [vmem:[%s370_s3 + $0x28] sm:$0xff]  }
   0x3   :  { %v23_v3 = vpack.c.bf16 %v22_v2, %v22_v2  ;;  %257 = vmatprep.mubr.msk.bf16.mxu1 %vm296_vm0, %v295_v1  ;;  %242 = vmatpush3.bf16.msra.mxu1 %v265_v4 }
   0x4   :  { %243 = vmatprep.subr.bf16.mxu1 %v295_v1 }
   0x5   :  { %238 = vmatmul.mubr.msk.bf16.vlgmr.msra.gmra.mxu0 %vm39_vm1, %v23_v3 }
   0x7   :  { %244 = vmatpush3.bf16.msra.mxu1 %v266_v5 }
   0x8   :  { %245 = vmatprep.subr.bf16.mxu1 %v295_v1 }
   0x9   :  { %10 = vsyncpa [#allocation3], 0  ;;  %v268_v7 = vld [vmem:[%s370_s3 + $0x20] sm:$0xff]   ;;  %v269_v8 = vld [vmem:[%s370_s3 + $0x18] sm:$0xff]   ;;  %s297_s15 = smov [#allocation2]   ;;  %vm196_vm2 = vcmask 58368  }
   0xa   :  { %v270_v9 = vld [vmem:[%s370_s3 + $0x10] sm:$0xff]   ;;  %v271_v10 = vld [vmem:[%s370_s3 + $0x8] sm:$0xff]   ;;  %v272_v11 = vld [vmem:[%s370_s3] sm:$0xff]   ;;  %s204_s16 = sshll.u32 %s297_s15, 4  ;;  %s205_s16 = int_to_ptr.vmem [resolvable:$true] %s204_s16 }
   0xb   :  { %246 = vmatpush3.bf16.msra.mxu1 %v267_v6  ;;  %v212_v12 = vld [vmem:[%s369_s2] ss:$0 sm:$0xff]  ;;  %s273_s2 = scalar_lea.vmem %s205_s16, 32  ;;  %p278_p1 = scmp.lt.s32.totalorder %s205_s16, %s205_s16 }
   0xc   :  { %247 = vmatprep.subr.bf16.mxu1 %v295_v1  ;;  %v215_v20 = vld [vmem:[%s371_s4] ss:$0 sm:$0xff]  ;;  %p274_p0 = scmp.ne.s32.totalorder %s205_s16, %s273_s2  ;;  %p279_p2 = scmp.lt.s32.totalorder %s273_s2, %s273_s2 }
   0xe   :  { %p280_p3 = por %p279_p2, %p278_p1 }
   0xf   :  { %248 = vmatpush3.bf16.msra.mxu1 %v268_v7 }
  0x10   :  { %249 = vmatprep.subr.bf16.mxu1 %v295_v1  ;;  %p281_p4 = pnand %p280_p3, %p274_p0 }
  0x13   :  { %250 = vmatpush3.bf16.msra.mxu1 %v269_v8 }
  0x14   :  { %251 = vmatprep.subr.bf16.mxu1 %v295_v1 }
  0x17   :  { %252 = vmatpush3.bf16.msra.mxu1 %v270_v9 }
  0x18   :  { %253 = vmatprep.subr.bf16.mxu1 %v295_v1 }
  0x1b   :  { %254 = vmatpush3.bf16.msra.mxu1 %v271_v10 }
  0x1c   :  { %255 = vmatprep.subr.bf16.mxu1 %v295_v1 }
  0x1f   :  { %256 = vmatpush3.bf16.msra.mxu1 %v272_v11 }
  0xc5   :  { %v77_v13 = vpop.f32.mrf.mxu0 }
  0xc6   :  { %v78_v14 = vadd.f32 %v212_v12, %v77_v13 }
  0xc7   :  { %v239_v15 = vpop.f32.mrf.mxu0 }
  0xc8   :  { %v83_v16 = vmax.f32 %v78_v14, 0.0 }
  0xc9   :  { %v80_v17 = vpop.f32.mrf.mxu0 }
  0xca   :  { %v84_v18 = vpack.c.bf16 %v83_v16, %v83_v16 }
  0xcb   :  { %v240_v19 = vpop.f32.mrf.mxu0 }
  0xcc   :  { %258 = vmatmul.mubr.bf16.vlgmr.msra.gmra.mxu1 %v84_v18 }
 0x18c   :  { %v190_v21 = vpop.f32.mrf.mxu1 }
 0x18d   :  { %v191_v22 = vadd.f32 %v215_v20, %v190_v21 }
 0x18e   :  { %v259_v23 = vpop.f32.mrf.mxu1 }
 0x18f   :  { %197 = vst.msk [vmem:[#allocation2] sm:$0x3] %vm196_vm2, %v191_v22 }
 0x190   :  { %v193_v24 = vpop.f32.mrf.mxu1 }
 0x191   :  { %284 = shalt.err (!%p281_p4)
}
 0x192   :  { %207 = dma.vmem_to_hbm [thread:$0]  %s205_s16, 32, %s372_s5, [#allocation3]   ;;  %v260_v25 = vpop.f32.mrf.mxu1 }
 0x193   :  { %293 = dma.done.wait [#allocation3], 32  }
 0x194   :  { %294 = vsyncadd [#allocation3], 4294967264 }
 0x195   :  { %211 = vsyncpa [#allocation3], 1 }

</bundles_post_ra>
